<compile_context>
chip_gen: v7x
topology: tpu7x:2x2x1
jax: 0.10.0
libtpu: 0.0.40
codegen_flags: <defaults>
</compile_context>

<pallas_src>
import functools

import jax
import jax.numpy as jnp
from jax.experimental import pallas as pl
from jax.experimental.pallas import tpu as pltpu

_VMEM = pl.BlockSpec(memory_space=pltpu.MemorySpace.VMEM)
_LN_EPS = 1e-5
_BN_EPS = 1e-5


# ------------------------------ Pallas kernel ------------------------------- #

def _layernorm(x, g, b):
    mu = jnp.mean(x, axis=-1, keepdims=True)
    var = jnp.mean((x - mu) ** 2, axis=-1, keepdims=True)
    return (x - mu) * jax.lax.rsqrt(var + _LN_EPS) * g + b


def _fused_forward_kernel(*refs, nlayers, nout, ghc, nhid, nbatch, rows):
    # input refs:
    #   adj [N,N] bf16, x [N,F_in] bf16,
    #   nlayers x (w1 bf16, w2' bf16)         [eval-BN folded into w2' / slab b2']
    #   pool [B,N] bf16 (unnormalized one-hot),
    #   p1w bf16, p2w bf16, cls [B,768] bf16, t1w bf16, t2w bf16,
    #   slab [R,128] f32  (all biases / LN params / 1-over-counts rows, packed)
    # output ref:
    #   out [B, 128] f32  (graph result in [:, :nout], text in [:, nout:2*nout])
    idx = 0
    adj_ref = refs[idx]; idx += 1
    x_ref = refs[idx]; idx += 1
    w_refs = refs[idx: idx + 2 * nlayers]; idx += 2 * nlayers
    (pool_ref, p1w_ref, p2w_ref, cls_ref, t1w_ref, t2w_ref,
     slab_ref, out_ref) = refs[idx:]

    def vec(name, width):          # static-offset slice out of the packed slab
        r = rows[name]
        return slab_ref[r:r + 1, :width]

    adj = adj_ref[...]             # stays resident in VMEM across all layers
    h = x_ref[...]
    for i in range(nlayers):       # nlayers is static -> unrolled
        w1 = w_refs[2 * i][...]
        w2 = w_refs[2 * i + 1][...]
        b1 = vec(f"b1_{i}", 2 * ghc)
        b2 = vec(f"b2_{i}", ghc)
        # GINConv (eps=0): aggregate (A + I) @ h, then Linear -> ReLU -> Linear.
        agg = jnp.dot(adj, h, preferred_element_type=jnp.float32)
        z = jnp.dot(agg.astype(jnp.bfloat16), w1,
                    preferred_element_type=jnp.float32) + b1
        z = jnp.maximum(z, 0.0)
        z = jnp.dot(z.astype(jnp.bfloat16), w2,
                    preferred_element_type=jnp.float32) + b2
        # BatchNorm (eval) folded into w2/b2; dropout = identity (eval);
        # ReLU on all but the last GIN layer (matches the PyTorch loop).
        if i != nlayers - 1:
            z = jnp.maximum(z, 0.0)
        h = z.astype(jnp.bfloat16)

    # global_mean_pool: bf16 one-hot matmul (exact) + f32 1/counts row scaling,
    # then projection1 -> relu -> projection2 -> LayerNorm(nout).
    hg = jnp.dot(pool_ref[...], h, preferred_element_type=jnp.float32)   # [B,ghc]
    inv = slab_ref[rows["inv"]:rows["inv"] + nbatch, :ghc]                # [B,ghc]
    hg = hg * inv
    g = jnp.dot(hg.astype(jnp.bfloat16), p1w_ref[...],
                preferred_element_type=jnp.float32) + vec("p1b", nhid)
    g = jnp.maximum(g, 0.0)
    g = jnp.dot(g.astype(jnp.bfloat16), p2w_ref[...],
                preferred_element_type=jnp.float32) + vec("p2b", nout)
    g = _layernorm(g, vec("ln2_g", nout), vec("ln2_b", nout))

    # text head: linear1 -> relu -> (dropout=id) -> linear2 -> LayerNorm(nout)
    t = jnp.dot(cls_ref[...], t1w_ref[...],
                preferred_element_type=jnp.float32) + vec("t1b", nhid)
    t = jnp.maximum(t, 0.0)
    t = jnp.dot(t.astype(jnp.bfloat16), t2w_ref[...],
                preferred_element_type=jnp.float32) + vec("t2b", nout)
    t = _layernorm(t, vec("tln_g", nout), vec("tln_b", nout))

    # single lane-dense full-width store (no masked partial stores)
    pad_w = out_ref.shape[1] - 2 * nout
    out_ref[...] = jnp.concatenate(
        [g, t, jnp.zeros((nbatch, pad_w), jnp.float32)], axis=-1)


# -------------------------------- wrapper ------------------------------------ #

def ginmol_fused(adj, x, gin_weights, gin_biases, pool, inv_counts,
                 p1w, p1b, p2w, p2b, ln2_g, ln2_b,
                 cls_x, t1w, t1b, t2w, t2b, tln_g, tln_b):
    nlayers = len(gin_weights)
    n = adj.shape[0]
    b = pool.shape[0]
    ghc = gin_weights[0][1].shape[1]
    nhid = p1w.shape[1]
    nout = p2w.shape[1]

    # ---- pack all tiny (1,C) f32 operands + 1/counts rows into one slab ----
    entries, rows = [], {}

    def add(name, v):
        rows[name] = len(entries)
        entries.append(v.astype(jnp.float32))

    for i, (b1, b2) in enumerate(gin_biases):
        add(f"b1_{i}", b1)
        add(f"b2_{i}", b2)
    add("p1b", p1b); add("p2b", p2b); add("ln2_g", ln2_g); add("ln2_b", ln2_b)
    add("t1b", t1b); add("t2b", t2b); add("tln_g", tln_g); add("tln_b", tln_b)

    max_w = max(v.shape[1] for v in entries)
    slab_w = max(128, ((max_w + 127) // 128) * 128)
    padded = [jnp.pad(v, ((0, 0), (0, slab_w - v.shape[1]))) for v in entries]
    rows["inv"] = len(entries)
    inv_block = jnp.broadcast_to(inv_counts.astype(jnp.float32), (b, slab_w))
    slab = jnp.concatenate(padded + [inv_block], axis=0)          # [R, slab_w] f32

    flat_w = []
    for (w1, w2) in gin_weights:
        flat_w += [w1, w2]

    out_w = max(128, ((2 * nout + 127) // 128) * 128)             # lane-dense output

    args = (adj, x, *flat_w, pool, p1w, p2w, cls_x, t1w, t2w, slab)

    # advisory cost estimate (flops / bytes) for the XLA scheduler
    flops = 0
    for (w1, w2) in gin_weights:
        fin, h2 = w1.shape
        flops += 2 * n * n * fin + 2 * n * fin * h2 + 2 * n * h2 * ghc
    flops += 2 * b * n * ghc
    flops += 2 * b * ghc * nhid + 2 * b * nhid * nout
    flops += 2 * b * t1w.shape[0] * nhid + 2 * b * nhid * nout
    bytes_accessed = sum(int(a.size) * a.dtype.itemsize for a in args)
    bytes_accessed += b * out_w * 4

    kern = functools.partial(_fused_forward_kernel, nlayers=nlayers, nout=nout,
                             ghc=ghc, nhid=nhid, nbatch=b, rows=rows)
    out = pl.pallas_call(
        kern,
        out_shape=jax.ShapeDtypeStruct((b, out_w), jnp.float32),
        in_specs=[_VMEM] * len(args),
        out_specs=_VMEM,
        compiler_params=pltpu.CompilerParams(
            # 48 MiB: above the 16/32 MiB scoped defaults (v5e/v6e), below v7x's
            # 64 MiB physical VMEM, so the adj/h-resident design scales safely.
            vmem_limit_bytes=48 * 1024 * 1024),
        cost_estimate=pl.CostEstimate(flops=int(flops), transcendentals=4 * b,
                                      bytes_accessed=int(bytes_accessed)),
    )(*args)
    return out[:, :nout], out[:, nout:2 * nout]


# --------------------------- parameter building ----------------------------- #

def _dense(key, fan_in, fan_out):
    # deterministic init; weights stored already transposed as [fan_in, fan_out]
    kw, kb = jax.random.split(key)
    bound = 1.0 / jnp.sqrt(float(fan_in))
    w = jax.random.uniform(kw, (fan_in, fan_out), jnp.float32, -bound, bound)
    b = jax.random.uniform(kb, (1, fan_out), jnp.float32, -bound, bound)
    return w, b


def init_params(key, num_node_features, nout, nhid, nlayers, ghc, vocab, bert_dim):
    keys = jax.random.split(key, 4 * nlayers + 5)
    k_iter = iter(keys)
    p = {"gin_layers": []}
    for i in range(nlayers):
        n_in = num_node_features if i == 0 else ghc
        w1, b1 = _dense(next(k_iter), n_in, 2 * ghc)
        w2, b2 = _dense(next(k_iter), 2 * ghc, ghc)
        gamma = 1.0 + 0.1 * jax.random.normal(next(k_iter), (1, ghc), jnp.float32)
        beta = 0.1 * jax.random.normal(next(k_iter), (1, ghc), jnp.float32)
        mean = jnp.zeros((1, ghc), jnp.float32)
        var = jnp.ones((1, ghc), jnp.float32)
        p["gin_layers"].append((w1, b1, w2, b2, gamma, beta, mean, var))
    p["proj1"] = _dense(next(k_iter), ghc, nhid)
    p["proj2"] = _dense(next(k_iter), nhid, nout)
    p["ln2_g"] = jnp.ones((1, nout), jnp.float32)
    p["ln2_b"] = jnp.zeros((1, nout), jnp.float32)
    # text encoder (BERT substitute + head)
    p["emb"] = 0.02 * jax.random.normal(next(k_iter), (vocab, bert_dim), jnp.float32)
    p["t_lin1"] = _dense(next(k_iter), bert_dim, nhid)
    p["t_lin2"] = _dense(next(k_iter), nhid, nout)
    p["t_ln_g"] = jnp.ones((1, nout), jnp.float32)
    p["t_ln_b"] = jnp.zeros((1, nout), jnp.float32)
    return p


# ------------------------------ model forward ------------------------------- #

def ginmol_forward(params, x, edge_index, batch, input_ids, attention_mask,
                   num_graphs):
    n = x.shape[0]
    # adjacency with self loops: A[dst, src] += 1, plus identity ((1+eps)*x_i, eps=0).
    # Built in f32 then cast to bf16 (exact while per-entry edge multiplicity <= 256).
    src, dst = edge_index[0], edge_index[1]
    adj = (jnp.zeros((n, n), jnp.float32).at[dst, src].add(1.0)
           + jnp.eye(n, dtype=jnp.float32))

    # mean-pool: UNNORMALIZED one-hot matrix in bf16 (0/1 entries are exact) and a
    # separate f32 1/counts vector applied after the matmul inside the kernel.
    onehot = jax.nn.one_hot(batch, num_graphs, dtype=jnp.float32).T      # [B, N]
    counts = jnp.maximum(jnp.sum(onehot, axis=1, keepdims=True), 1.0)    # [B, 1]
    inv_counts = 1.0 / counts

    # fold eval-mode BatchNorm into the second linear of each GIN MLP
    gin_weights, gin_biases = [], []
    for (w1, b1, w2, b2, gamma, beta, mean, var) in params["gin_layers"]:
        scale = gamma * jax.lax.rsqrt(var + _BN_EPS)                     # [1, ghc]
        w2f = (w2 * scale).astype(jnp.bfloat16)
        b2f = (b2 - mean) * scale + beta
        gin_weights.append((w1.astype(jnp.bfloat16), w2f))
        gin_biases.append((b1, b2f))

    # ---- text branch: gather only the CLS-token embedding (no [B,S,768] temp) ----
    # TODO(synk): attention_mask is unused by the deterministic BERT substitute.
    cls = params["emb"][input_ids[:, 0]].astype(jnp.bfloat16)            # [B, 768]

    p1w, p1b = params["proj1"]
    p2w, p2b = params["proj2"]
    t1w, t1b = params["t_lin1"]
    t2w, t2b = params["t_lin2"]

    graph_encoded, text_encoded = ginmol_fused(
        adj.astype(jnp.bfloat16), x.astype(jnp.bfloat16),
        gin_weights, gin_biases,
        onehot.astype(jnp.bfloat16), inv_counts,
        p1w.astype(jnp.bfloat16), p1b, p2w.astype(jnp.bfloat16), p2b,
        params["ln2_g"], params["ln2_b"],
        cls, t1w.astype(jnp.bfloat16), t1b, t2w.astype(jnp.bfloat16), t2b,
        params["t_ln_g"], params["t_ln_b"])
    return graph_encoded, text_encoded


# ---------------------------------- main ------------------------------------ #

if __name__ == "__main__":
    key = jax.random.PRNGKey(0)

    # config (small, consistent with the module's __init__ signature)
    num_node_features = 8
    nout = 16
    nhid = 32
    nlayers = 2
    graph_hidden_channels = 32
    vocab = 64
    bert_dim = 768

    # synthetic graph batch: 2 graphs, 8 nodes each
    N, B, E, S = 16, 2, 32, 8
    k1, k2, k3, k4 = jax.random.split(key, 4)
    x = jax.random.normal(k1, (N, num_node_features), jnp.float32)
    edge_index = jax.random.randint(k2, (2, E), 0, N, jnp.int32)
    batch = jnp.concatenate([jnp.zeros((N // 2,), jnp.int32),
                             jnp.ones((N // 2,), jnp.int32)])
    input_ids = jax.random.randint(k3, (B, S), 0, vocab, jnp.int32)
    attention_mask = jnp.ones((B, S), jnp.int32)

    params = init_params(k4, num_node_features, nout, nhid, nlayers,
                         graph_hidden_channels, vocab, bert_dim)

    graph_out, text_out = ginmol_forward(params, x, edge_index, batch,
                                         input_ids, attention_mask, num_graphs=B)
    jax.block_until_ready(graph_out)
    jax.block_until_ready(text_out)
    assert graph_out.shape == (B, nout) and text_out.shape == (B, nout)
    print("KERNEL_OK")
</pallas_src>

<mosaic_0001>
module attributes {stable_mosaic.version = 11 : i64} {
  func.func @_fused_forward_kernel(%arg0: memref<16x16xbf16, #tpu.memory_space<vmem>>, %arg1: memref<16x8xbf16, #tpu.memory_space<vmem>>, %arg2: memref<8x64xbf16, #tpu.memory_space<vmem>>, %arg3: memref<64x32xbf16, #tpu.memory_space<vmem>>, %arg4: memref<32x64xbf16, #tpu.memory_space<vmem>>, %arg5: memref<64x32xbf16, #tpu.memory_space<vmem>>, %arg6: memref<2x16xbf16, #tpu.memory_space<vmem>>, %arg7: memref<32x32xbf16, #tpu.memory_space<vmem>>, %arg8: memref<32x16xbf16, #tpu.memory_space<vmem>>, %arg9: memref<2x768xbf16, #tpu.memory_space<vmem>>, %arg10: memref<768x32xbf16, #tpu.memory_space<vmem>>, %arg11: memref<32x16xbf16, #tpu.memory_space<vmem>>, %arg12: memref<14x128xf32, #tpu.memory_space<vmem>>, %arg13: memref<2x128xf32, #tpu.memory_space<vmem>>) attributes {dimension_semantics = [], scalar_prefetch = 0 : i64, scratch_operands = 0 : i64, tpu.core_type = #tpu.core_type<tc>} {
    %c0 = arith.constant 0 : index
    %c0_0 = arith.constant 0 : index
    %0 = vector.load %arg0[%c0, %c0_0] : memref<16x16xbf16, #tpu.memory_space<vmem>>, vector<16x16xbf16>
    %c0_1 = arith.constant 0 : index
    %c0_2 = arith.constant 0 : index
    %1 = vector.load %arg1[%c0_1, %c0_2] : memref<16x8xbf16, #tpu.memory_space<vmem>>, vector<16x8xbf16>
    %c0_3 = arith.constant 0 : index
    %c0_4 = arith.constant 0 : index
    %2 = vector.load %arg2[%c0_3, %c0_4] : memref<8x64xbf16, #tpu.memory_space<vmem>>, vector<8x64xbf16>
    %c0_5 = arith.constant 0 : index
    %c0_6 = arith.constant 0 : index
    %3 = vector.load %arg3[%c0_5, %c0_6] : memref<64x32xbf16, #tpu.memory_space<vmem>>, vector<64x32xbf16>
    %c0_7 = arith.constant 0 : index
    %c0_8 = arith.constant 0 : index
    %4 = vector.load %arg12[%c0_7, %c0_8] : memref<14x128xf32, #tpu.memory_space<vmem>>, vector<1x64xf32>
    %c1 = arith.constant 1 : index
    %c0_9 = arith.constant 0 : index
    %5 = vector.load %arg12[%c1, %c0_9] : memref<14x128xf32, #tpu.memory_space<vmem>>, vector<1x32xf32>
    %cst = arith.constant dense<0.000000e+00> : vector<16x8xf32>
    %6 = tpu.matmul %0, %1, %cst {dimension_numbers = #tpu.dot_dimension_numbers<[1], [0], [0], [1], [0, 0, 1, 1], [], []>} : vector<16x16xbf16>, vector<16x8xbf16>, vector<16x8xf32> -> vector<16x8xf32>
    %7 = arith.truncf %6 : vector<16x8xf32> to vector<16x8xbf16>
    %cst_10 = arith.constant dense<0.000000e+00> : vector<16x64xf32>
    %8 = tpu.matmul %7, %2, %cst_10 {dimension_numbers = #tpu.dot_dimension_numbers<[1], [0], [0], [1], [0, 0, 1, 1], [], []>} : vector<16x8xbf16>, vector<8x64xbf16>, vector<16x64xf32> -> vector<16x64xf32>
    %9 = vector.broadcast %4 : vector<1x64xf32> to vector<16x64xf32>
    %10 = arith.addf %8, %9 : vector<16x64xf32>
    %cst_11 = arith.constant 0.000000e+00 : f32
    %11 = vector.broadcast %cst_11 : f32 to vector<16x64xf32>
    %12 = arith.maximumf %10, %11 : vector<16x64xf32>
    %13 = arith.truncf %12 : vector<16x64xf32> to vector<16x64xbf16>
    %cst_12 = arith.constant dense<0.000000e+00> : vector<16x32xf32>
    %14 = tpu.matmul %13, %3, %cst_12 {dimension_numbers = #tpu.dot_dimension_numbers<[1], [0], [0], [1], [0, 0, 1, 1], [], []>} : vector<16x64xbf16>, vector<64x32xbf16>, vector<16x32xf32> -> vector<16x32xf32>
    %15 = vector.broadcast %5 : vector<1x32xf32> to vector<16x32xf32>
    %16 = arith.addf %14, %15 : vector<16x32xf32>
    %cst_13 = arith.constant 0.000000e+00 : f32
    %17 = vector.broadcast %cst_13 : f32 to vector<16x32xf32>
    %18 = arith.maximumf %16, %17 : vector<16x32xf32>
    %19 = arith.truncf %18 : vector<16x32xf32> to vector<16x32xbf16>
    %c0_14 = arith.constant 0 : index
    %c0_15 = arith.constant 0 : index
    %20 = vector.load %arg4[%c0_14, %c0_15] : memref<32x64xbf16, #tpu.memory_space<vmem>>, vector<32x64xbf16>
    %c0_16 = arith.constant 0 : index
    %c0_17 = arith.constant 0 : index
    %21 = vector.load %arg5[%c0_16, %c0_17] : memref<64x32xbf16, #tpu.memory_space<vmem>>, vector<64x32xbf16>
    %c2 = arith.constant 2 : index
    %c0_18 = arith.constant 0 : index
    %22 = vector.load %arg12[%c2, %c0_18] : memref<14x128xf32, #tpu.memory_space<vmem>>, vector<1x64xf32>
    %c3 = arith.constant 3 : index
    %c0_19 = arith.constant 0 : index
    %23 = vector.load %arg12[%c3, %c0_19] : memref<14x128xf32, #tpu.memory_space<vmem>>, vector<1x32xf32>
    %cst_20 = arith.constant dense<0.000000e+00> : vector<16x32xf32>
    %24 = tpu.matmul %0, %19, %cst_20 {dimension_numbers = #tpu.dot_dimension_numbers<[1], [0], [0], [1], [0, 0, 1, 1], [], []>} : vector<16x16xbf16>, vector<16x32xbf16>, vector<16x32xf32> -> vector<16x32xf32>
    %25 = arith.truncf %24 : vector<16x32xf32> to vector<16x32xbf16>
    %cst_21 = arith.constant dense<0.000000e+00> : vector<16x64xf32>
    %26 = tpu.matmul %25, %20, %cst_21 {dimension_numbers = #tpu.dot_dimension_numbers<[1], [0], [0], [1], [0, 0, 1, 1], [], []>} : vector<16x32xbf16>, vector<32x64xbf16>, vector<16x64xf32> -> vector<16x64xf32>
    %27 = vector.broadcast %22 : vector<1x64xf32> to vector<16x64xf32>
    %28 = arith.addf %26, %27 : vector<16x64xf32>
    %cst_22 = arith.constant 0.000000e+00 : f32
    %29 = vector.broadcast %cst_22 : f32 to vector<16x64xf32>
    %30 = arith.maximumf %28, %29 : vector<16x64xf32>
    %31 = arith.truncf %30 : vector<16x64xf32> to vector<16x64xbf16>
    %cst_23 = arith.constant dense<0.000000e+00> : vector<16x32xf32>
    %32 = tpu.matmul %31, %21, %cst_23 {dimension_numbers = #tpu.dot_dimension_numbers<[1], [0], [0], [1], [0, 0, 1, 1], [], []>} : vector<16x64xbf16>, vector<64x32xbf16>, vector<16x32xf32> -> vector<16x32xf32>
    %33 = vector.broadcast %23 : vector<1x32xf32> to vector<16x32xf32>
    %34 = arith.addf %32, %33 : vector<16x32xf32>
    %35 = arith.truncf %34 : vector<16x32xf32> to vector<16x32xbf16>
    %c0_24 = arith.constant 0 : index
    %c0_25 = arith.constant 0 : index
    %36 = vector.load %arg6[%c0_24, %c0_25] : memref<2x16xbf16, #tpu.memory_space<vmem>>, vector<2x16xbf16>
    %cst_26 = arith.constant dense<0.000000e+00> : vector<2x32xf32>
    %37 = tpu.matmul %36, %35, %cst_26 {dimension_numbers = #tpu.dot_dimension_numbers<[1], [0], [0], [1], [0, 0, 1, 1], [], []>} : vector<2x16xbf16>, vector<16x32xbf16>, vector<2x32xf32> -> vector<2x32xf32>
    %c12 = arith.constant 12 : index
    %c0_27 = arith.constant 0 : index
    %38 = vector.load %arg12[%c12, %c0_27] : memref<14x128xf32, #tpu.memory_space<vmem>>, vector<2x32xf32>
    %39 = arith.mulf %37, %38 : vector<2x32xf32>
    %40 = arith.truncf %39 : vector<2x32xf32> to vector<2x32xbf16>
    %c0_28 = arith.constant 0 : index
    %c0_29 = arith.constant 0 : index
    %41 = vector.load %arg7[%c0_28, %c0_29] : memref<32x32xbf16, #tpu.memory_space<vmem>>, vector<32x32xbf16>
    %cst_30 = arith.constant dense<0.000000e+00> : vector<2x32xf32>
    %42 = tpu.matmul %40, %41, %cst_30 {dimension_numbers = #tpu.dot_dimension_numbers<[1], [0], [0], [1], [0, 0, 1, 1], [], []>} : vector<2x32xbf16>, vector<32x32xbf16>, vector<2x32xf32> -> vector<2x32xf32>
    %c4 = arith.constant 4 : index
    %c0_31 = arith.constant 0 : index
    %43 = vector.load %arg12[%c4, %c0_31] : memref<14x128xf32, #tpu.memory_space<vmem>>, vector<1x32xf32>
    %44 = vector.broadcast %43 : vector<1x32xf32> to vector<2x32xf32>
    %45 = arith.addf %42, %44 : vector<2x32xf32>
    %cst_32 = arith.constant 0.000000e+00 : f32
    %46 = vector.broadcast %cst_32 : f32 to vector<2x32xf32>
    %47 = arith.maximumf %45, %46 : vector<2x32xf32>
    %48 = arith.truncf %47 : vector<2x32xf32> to vector<2x32xbf16>
    %c0_33 = arith.constant 0 : index
    %c0_34 = arith.constant 0 : index
    %49 = vector.load %arg8[%c0_33, %c0_34] : memref<32x16xbf16, #tpu.memory_space<vmem>>, vector<32x16xbf16>
    %cst_35 = arith.constant dense<0.000000e+00> : vector<2x16xf32>
    %50 = tpu.matmul %48, %49, %cst_35 {dimension_numbers = #tpu.dot_dimension_numbers<[1], [0], [0], [1], [0, 0, 1, 1], [], []>} : vector<2x32xbf16>, vector<32x16xbf16>, vector<2x16xf32> -> vector<2x16xf32>
    %c5 = arith.constant 5 : index
    %c0_36 = arith.constant 0 : index
    %51 = vector.load %arg12[%c5, %c0_36] : memref<14x128xf32, #tpu.memory_space<vmem>>, vector<1x16xf32>
    %52 = vector.broadcast %51 : vector<1x16xf32> to vector<2x16xf32>
    %53 = arith.addf %50, %52 : vector<2x16xf32>
    %c6 = arith.constant 6 : index
    %c0_37 = arith.constant 0 : index
    %54 = vector.load %arg12[%c6, %c0_37] : memref<14x128xf32, #tpu.memory_space<vmem>>, vector<1x16xf32>
    %c7 = arith.constant 7 : index
    %c0_38 = arith.constant 0 : index
    %55 = vector.load %arg12[%c7, %c0_38] : memref<14x128xf32, #tpu.memory_space<vmem>>, vector<1x16xf32>
    %cst_39 = arith.constant dense<0.000000e+00> : vector<2xf32>
    %56 = vector.multi_reduction <add>, %53, %cst_39 [1] : vector<2x16xf32> to vector<2xf32>
    %57 = vector.shape_cast %56 : vector<2xf32> to vector<2x1xf32>
    %cst_40 = arith.constant 1.600000e+01 : f32
    %58 = vector.broadcast %cst_40 : f32 to vector<2x1xf32>
    %59 = arith.divf %57, %58 : vector<2x1xf32>
    %60 = vector.broadcast %59 : vector<2x1xf32> to vector<2x16xf32>
    %61 = arith.subf %53, %60 : vector<2x16xf32>
    %62 = arith.mulf %61, %61 : vector<2x16xf32>
    %cst_41 = arith.constant dense<0.000000e+00> : vector<2xf32>
    %63 = vector.multi_reduction <add>, %62, %cst_41 [1] : vector<2x16xf32> to vector<2xf32>
    %64 = vector.shape_cast %63 : vector<2xf32> to vector<2x1xf32>
    %cst_42 = arith.constant 1.600000e+01 : f32
    %65 = vector.broadcast %cst_42 : f32 to vector<2x1xf32>
    %66 = arith.divf %64, %65 : vector<2x1xf32>
    %67 = vector.broadcast %59 : vector<2x1xf32> to vector<2x16xf32>
    %68 = arith.subf %53, %67 : vector<2x16xf32>
    %cst_43 = arith.constant 9.99999974E-6 : f32
    %69 = vector.broadcast %cst_43 : f32 to vector<2x1xf32>
    %70 = arith.addf %66, %69 : vector<2x1xf32>
    %71 = math.rsqrt %70 : vector<2x1xf32>
    %72 = vector.broadcast %71 : vector<2x1xf32> to vector<2x16xf32>
    %73 = arith.mulf %68, %72 : vector<2x16xf32>
    %74 = vector.broadcast %54 : vector<1x16xf32> to vector<2x16xf32>
    %75 = arith.mulf %73, %74 : vector<2x16xf32>
    %76 = vector.broadcast %55 : vector<1x16xf32> to vector<2x16xf32>
    %77 = arith.addf %75, %76 : vector<2x16xf32>
    %c0_44 = arith.constant 0 : index
    %c0_45 = arith.constant 0 : index
    %78 = vector.load %arg9[%c0_44, %c0_45] : memref<2x768xbf16, #tpu.memory_space<vmem>>, vector<2x768xbf16>
    %c0_46 = arith.constant 0 : index
    %c0_47 = arith.constant 0 : index
    %79 = vector.load %arg10[%c0_46, %c0_47] : memref<768x32xbf16, #tpu.memory_space<vmem>>, vector<768x32xbf16>
    %cst_48 = arith.constant dense<0.000000e+00> : vector<2x32xf32>
    %80 = tpu.matmul %78, %79, %cst_48 {dimension_numbers = #tpu.dot_dimension_numbers<[1], [0], [0], [1], [0, 0, 1, 1], [], []>} : vector<2x768xbf16>, vector<768x32xbf16>, vector<2x32xf32> -> vector<2x32xf32>
    %c8 = arith.constant 8 : index
    %c0_49 = arith.constant 0 : index
    %81 = vector.load %arg12[%c8, %c0_49] : memref<14x128xf32, #tpu.memory_space<vmem>>, vector<1x32xf32>
    %82 = vector.broadcast %81 : vector<1x32xf32> to vector<2x32xf32>
    %83 = arith.addf %80, %82 : vector<2x32xf32>
    %cst_50 = arith.constant 0.000000e+00 : f32
    %84 = vector.broadcast %cst_50 : f32 to vector<2x32xf32>
    %85 = arith.maximumf %83, %84 : vector<2x32xf32>
    %86 = arith.truncf %85 : vector<2x32xf32> to vector<2x32xbf16>
    %c0_51 = arith.constant 0 : index
    %c0_52 = arith.constant 0 : index
    %87 = vector.load %arg11[%c0_51, %c0_52] : memref<32x16xbf16, #tpu.memory_space<vmem>>, vector<32x16xbf16>
    %cst_53 = arith.constant dense<0.000000e+00> : vector<2x16xf32>
    %88 = tpu.matmul %86, %87, %cst_53 {dimension_numbers = #tpu.dot_dimension_numbers<[1], [0], [0], [1], [0, 0, 1, 1], [], []>} : vector<2x32xbf16>, vector<32x16xbf16>, vector<2x16xf32> -> vector<2x16xf32>
    %c9 = arith.constant 9 : index
    %c0_54 = arith.constant 0 : index
    %89 = vector.load %arg12[%c9, %c0_54] : memref<14x128xf32, #tpu.memory_space<vmem>>, vector<1x16xf32>
    %90 = vector.broadcast %89 : vector<1x16xf32> to vector<2x16xf32>
    %91 = arith.addf %88, %90 : vector<2x16xf32>
    %c10 = arith.constant 10 : index
    %c0_55 = arith.constant 0 : index
    %92 = vector.load %arg12[%c10, %c0_55] : memref<14x128xf32, #tpu.memory_space<vmem>>, vector<1x16xf32>
    %c11 = arith.constant 11 : index
    %c0_56 = arith.constant 0 : index
    %93 = vector.load %arg12[%c11, %c0_56] : memref<14x128xf32, #tpu.memory_space<vmem>>, vector<1x16xf32>
    %cst_57 = arith.constant dense<0.000000e+00> : vector<2xf32>
    %94 = vector.multi_reduction <add>, %91, %cst_57 [1] : vector<2x16xf32> to vector<2xf32>
    %95 = vector.shape_cast %94 : vector<2xf32> to vector<2x1xf32>
    %cst_58 = arith.constant 1.600000e+01 : f32
    %96 = vector.broadcast %cst_58 : f32 to vector<2x1xf32>
    %97 = arith.divf %95, %96 : vector<2x1xf32>
    %98 = vector.broadcast %97 : vector<2x1xf32> to vector<2x16xf32>
    %99 = arith.subf %91, %98 : vector<2x16xf32>
    %100 = arith.mulf %99, %99 : vector<2x16xf32>
    %cst_59 = arith.constant dense<0.000000e+00> : vector<2xf32>
    %101 = vector.multi_reduction <add>, %100, %cst_59 [1] : vector<2x16xf32> to vector<2xf32>
    %102 = vector.shape_cast %101 : vector<2xf32> to vector<2x1xf32>
    %cst_60 = arith.constant 1.600000e+01 : f32
    %103 = vector.broadcast %cst_60 : f32 to vector<2x1xf32>
    %104 = arith.divf %102, %103 : vector<2x1xf32>
    %105 = vector.broadcast %97 : vector<2x1xf32> to vector<2x16xf32>
    %106 = arith.subf %91, %105 : vector<2x16xf32>
    %cst_61 = arith.constant 9.99999974E-6 : f32
    %107 = vector.broadcast %cst_61 : f32 to vector<2x1xf32>
    %108 = arith.addf %104, %107 : vector<2x1xf32>
    %109 = math.rsqrt %108 : vector<2x1xf32>
    %110 = vector.broadcast %109 : vector<2x1xf32> to vector<2x16xf32>
    %111 = arith.mulf %106, %110 : vector<2x16xf32>
    %112 = vector.broadcast %92 : vector<1x16xf32> to vector<2x16xf32>
    %113 = arith.mulf %111, %112 : vector<2x16xf32>
    %114 = vector.broadcast %93 : vector<1x16xf32> to vector<2x16xf32>
    %115 = arith.addf %113, %114 : vector<2x16xf32>
    %cst_62 = arith.constant 0.000000e+00 : f32
    %116 = vector.broadcast %cst_62 : f32 to vector<2x96xf32>
    %117 = tpu.concatenate %77, %115, %116 in 1 : vector<2x16xf32>, vector<2x16xf32>, vector<2x96xf32> -> vector<2x128xf32>
    %c0_63 = arith.constant 0 : index
    %c0_64 = arith.constant 0 : index
    %118 = vector.load %arg13[%c0_63, %c0_64] : memref<2x128xf32, #tpu.memory_space<vmem>>, vector<2x128xf32>
    tpu.vector_store %arg13[%c0_63, %c0_64], %117 {strides = array<i32>} : memref<2x128xf32, #tpu.memory_space<vmem>>, vector<2x128xf32>,
    return
  }
}

</mosaic_0001>

<bundles_post_ra>
// kernel: tpu_custom_call.1
= control target key start
LH: loop header
LB: loop body
LE: loop exit
PB: predicated region body
PF: predicated region fallthrough
CT: control target
= control target key end

     0   :  { %v1687_v1 = vmov 0.0   ;;  %vm1688_vm0 = vmmov 0   ;;  %vm72_vm1 = vcmask 130048   ;;  %s2080_s0 = inlined_call_operand.vmem [shape: bf16[16,16], index: 0, kind: input, shape index: {}]   ;;  %s2081_s1 = inlined_call_operand.vmem [shape: bf16[16,8], index: 1, kind: input, shape index: {}]   ;;  %s2082_s2 = inlined_call_operand.vmem [shape: bf16[8,64], index: 2, kind: input, shape index: {}]   ;;  %s2083_s3 = inlined_call_operand.vmem [shape: bf16[64,32], index: 3, kind: input, shape index: {}]   ;;  %s2084_s4 = inlined_call_operand.vmem [shape: bf16[32,64], index: 4, kind: input, shape index: {}]   ;;  %s2085_s5 = inlined_call_operand.vmem [shape: bf16[64,32], index: 5, kind: input, shape index: {}]   ;;  %s2086_s6 = inlined_call_operand.vmem [shape: bf16[2,16], index: 6, kind: input, shape index: {}]   ;;  %s2087_s7 = inlined_call_operand.vmem [shape: bf16[32,32], index: 7, kind: input, shape index: {}]   ;;  %s2088_s8 = inlined_call_operand.vmem [shape: bf16[32,16], index: 8, kind: input, shape index: {}]   ;;  %s2089_s9 = inlined_call_operand.vmem [shape: bf16[2,768], index: 9, kind: input, shape index: {}]   ;;  %s2090_s10 = inlined_call_operand.vmem [shape: bf16[768,32], index: 10, kind: input, shape index: {}]   ;;  %s2091_s11 = inlined_call_operand.vmem [shape: bf16[32,16], index: 11, kind: input, shape index: {}]   ;;  %s2092_s12 = inlined_call_operand.vmem [shape: f32[14,128], index: 12, kind: input, shape index: {}]   ;;  %s2093_s13 = inlined_call_operand.hbm [shape: f32[2,128], index: 13, kind: output, shape index: {}]  }
   0x1   :  { %v1592_v0 = vld [vmem:[%s2081_s1] sm:$0xff]   ;;  %1507 = vmatprep.subr.bf16.mxu0 %v1687_v1  ;;  %1531 = vmatprep.subr.bf16.mxu1 %v1687_v1 }
   0x2   :  { %v1593_v2 = vld [vmem:[%s2080_s0] sm:$0xff]   ;;  %1508 = vmatpush3.bf16.msra.mxu0 %v1592_v0  ;;  %1509 = vmatprep.mubr.msk.bf16.mxu0 %vm1688_vm0, %v1687_v1 }
   0x3   :  { %1513 = vmatprep.subr.bf16.mxu0 %v1687_v1  ;;  %1533 = vmatprep.mubr.msk.bf16.mxu1 %vm1688_vm0, %v1687_v1 }
   0x5   :  { %1510 = vmatmul.mubr.msk.bf16.vlgmr.msra.gmra.mrb[0].mxu0 %vm72_vm1, %v1593_v2 }
   0x6   :  { %1515 = vmatprep.mubr.msk.bf16.mxu0 %vm1688_vm0, %v1687_v1 }
   0x7   :  { %18 = vsyncpa [#allocation3], 0  ;;  %v50_v3 = vld [vmem:[%s2082_s2] sm:$0xf]  ;;  %vm126_vm2 = vcmask 1043456   ;;  %vm122_vm3 = vcmask 64512  }
   0x8   :  { %v128_v4 = vsel %vm126_vm2, %v50_v3, 0  ;;  %v1594_v8 = vld [vmem:[%s2083_s3] sm:$0xff]   ;;  %v1595_v11 = vld [vmem:[%s2083_s3 + $0x8] sm:$0xff]   ;;  %v1596_v12 = vld [vmem:[%s2083_s3 + $0x10] sm:$0xff]   ;;  %vm202_vm4 = vcmask 523264   ;;  %vm322_vm5 = vcmask 261120  }
   0x9   :  { %1514 = vmatpush3.bf16.msra.mxu0 %v128_v4  ;;  %v1597_v13 = vld [vmem:[%s2083_s3 + $0x18] sm:$0xff]   ;;  %v1326_v14 = vld [vmem:[%s2092_s12] ss:$0 sm:$0xff]  ;;  %v1328_v24 = vld [vmem:[%s2092_s12 + $0x1] ss:$0 sm:$0xff]  ;;  %vm622_vm6 = vcmask 123904  }
   0xa   :  { %1519 = vmatprep.subr.bf16.mxu0 %v1687_v1  ;;  %v1598_v34 = vld [vmem:[%s2084_s4] sm:$0xff]   ;;  %v1599_v35 = vld [vmem:[%s2084_s4 + $0x8] sm:$0xff]   ;;  %v1602_v43 = vld [vmem:[%s2085_s5 + $0x10] sm:$0xff]   ;;  %s1690_s1 = smov 16  }
   0xb   :  { %v1600_v36 = vld [vmem:[%s2085_s5] sm:$0xff]   ;;  %v1601_v37 = vld [vmem:[%s2085_s5 + $0x8] sm:$0xff]   ;;  %v1603_v44 = vld [vmem:[%s2085_s5 + $0x18] sm:$0xff]   ;;  %s1691_s5 = smov [#allocation2]  }
   0xc   :  { %v1335_v45 = vld [vmem:[%s2092_s12 + $0x2] ss:$0 sm:$0xff]  ;;  %v1339_v55 = vld [vmem:[%s2092_s12 + $0x3] ss:$0 sm:$0xff]  ;;  %v443_v63 = vld [vmem:[%s2086_s6] sm:$0x1] }
   0xd   :  { %v1604_v0 = vld [vmem:[%s2087_s7] sm:$0xff]  }
   0xe   :  { %v1606_v3 = vld [vmem:[%s2090_s10 + $0x40] sm:$0xff]  }
   0xf   :  { %v1618_v4 = vld [vmem:[%s2088_s8] sm:$0xff]  }
  0xd8   :  { %v110_v5 = vpop.f32.mrb[0].mxu0 }
  0xd9   :  { %v1511_v6 = vpop.f32.mrb[1].mxu0 }
  0xda   :  { %v113_v7 = vpop.f32.mrb[2].mxu0 }
  0xdb   :  { %v117_v9 = vpack.c.bf16 %v113_v7, %v110_v5  ;;  %v1512_v10 = vpop.f32.mrb[3].mxu0  ;;  %v487_v5 = vld [vmem:[%s2092_s12 + $0xc] sm:$0x3] }
  0xdc   :  { %v1607_v10 = vld [vmem:[%s2090_s10] sm:$0xff]  }
  0xdd   :  { %1516 = vmatmul.mubr.msk.bf16.vlgmr.msra.gmra.mrb[4].mxu0 %vm122_vm3, %v117_v9 }
  0xde   :  { %1520 = vmatpush3.bf16.msra.mxu0 %v1594_v8  ;;  %1527 = vmatprep.mubr.msk.bf16.mxu0 %vm1688_vm0, %v1687_v1 }
  0xdf   :  { %1521 = vmatprep.subr.bf16.mxu0 %v1687_v1 }
  0xe2   :  { %1522 = vmatpush3.bf16.msra.mxu0 %v1595_v11 }
  0xe3   :  { %1523 = vmatprep.subr.bf16.mxu0 %v1687_v1 }
  0xe6   :  { %1524 = vmatpush3.bf16.msra.mxu0 %v1596_v12 }
  0xe7   :  { %1525 = vmatprep.subr.bf16.mxu0 %v1687_v1 }
  0xea   :  { %1526 = vmatpush3.bf16.msra.mxu0 %v1597_v13  ;;  %v1608_v13 = vld [vmem:[%s2090_s10 + $0x48] sm:$0xff]  }
  0xeb   :  { %1545 = vmatprep.subr.bf16.mxu0 %v1687_v1 }
 0x1b0   :  { %v164_v15 = vpop.f32.mrb[4].mxu0 }
 0x1b1   :  { %v165_v16 = vadd.f32 %v1326_v14, %v164_v15  ;;  %v1517_v17 = vpop.f32.mrb[5].mxu0  ;;  %v1610_v15 = vld [vmem:[%s2090_s10 + $0x50] sm:$0xff]  }
 0x1b2   :  { %v167_v18 = vpop.f32.mrb[6].mxu0  ;;  %v1612_v17 = vld [vmem:[%s2090_s10 + $0x58] sm:$0xff]  }
 0x1b3   :  { %v168_v19 = vadd.f32 %v1326_v14, %v167_v18  ;;  %v1518_v20 = vpop.f32.mrb[7].mxu0  ;;  %v171_v21 = vmax.f32 %v165_v16, 0.0  ;;  %v1609_v14 = vld [vmem:[%s2090_s10 + $0x8] sm:$0xff]   ;;  %v1611_v16 = vld [vmem:[%s2090_s10 + $0x10] sm:$0xff]   ;;  %v1613_v18 = vld [vmem:[%s2090_s10 + $0x18] sm:$0xff]  }
 0x1b4   :  { %v1615_v20 = vld [vmem:[%s2090_s10 + $0x20] sm:$0xff]  }
 0x1b5   :  { %v172_v22 = vmax.f32 %v168_v19, 0.0  ;;  %v1614_v19 = vld [vmem:[%s2090_s10 + $0x60] sm:$0xff]  }
 0x1b7   :  { %v173_v23 = vpack.c.bf16 %v172_v22, %v171_v21  ;;  %v1616_v21 = vld [vmem:[%s2090_s10 + $0x68] sm:$0xff]  }
 0x1b8   :  { %v1617_v22 = vld [vmem:[%s2090_s10 + $0x28] sm:$0xff]  }
 0x1b9   :  { %1528 = vmatmul.mubr.msk.bf16.vlgmr.msra.gmra.mrb[8].mxu0 %vm202_vm4, %v173_v23  ;;  %v1689_v23 = vmov 1966171168  }
 0x1ba   :  { %1553 = vmatprep.mubr.msk.bf16.mxu0 %vm1688_vm0, %v1687_v1  ;;  %1546 = vmatpush3.bf16.msra.mxu0 %v1600_v36 }
 0x1bb   :  { %1547 = vmatprep.subr.bf16.mxu0 %v1687_v1 }
 0x1be   :  { %1548 = vmatpush3.bf16.msra.mxu0 %v1601_v37  ;;  %v1624_v37 = vld [vmem:[%s2090_s10 + $0xc0] sm:$0xff]  }
 0x1bf   :  { %1549 = vmatprep.subr.bf16.mxu0 %v1687_v1 }
 0x1c2   :  { %1550 = vmatpush3.bf16.msra.mxu0 %v1602_v43  ;;  %v1631_v43 = vld [vmem:[%s2090_s10 + $0x108] sm:$0xff]  }
 0x1c3   :  { %1551 = vmatprep.subr.bf16.mxu0 %v1687_v1 }
 0x1c6   :  { %1552 = vmatpush3.bf16.msra.mxu0 %v1603_v44  ;;  %v1634_v44 = vld [vmem:[%s2090_s10 + $0x150] sm:$0xff]  }
 0x1c7   :  { %1571 = vmatprep.subr.bf16.mxu0 %v1687_v1 }
 0x28c   :  { %v240_v25 = vpop.f32.mrb[8].mxu0 }
 0x28d   :  { %v241_v26 = vadd.f32 %v1328_v24, %v240_v25  ;;  %v1529_v27 = vpop.f32.mrb[9].mxu0  ;;  %v754_v25 = vlaneseq }
 0x28e   :  { %v243_v28 = vpop.f32.mrb[10].mxu0  ;;  %v1620_v27 = vld [vmem:[%s2090_s10 + $0x30] sm:$0xff]  }
 0x28f   :  { %v244_v29 = vadd.f32 %v1328_v24, %v243_v28  ;;  %v1530_v30 = vpop.f32.mrb[11].mxu0  ;;  %v247_v31 = vmax.f32 %v241_v26, 0.0  ;;  %v752_v24 = vunpack.c.l.s4 %v1689_v23  ;;  %v1619_v26 = vld [vmem:[%s2090_s10 + $0x70] sm:$0xff]  }
 0x291   :  { %v248_v32 = vmax.f32 %v244_v29, 0.0  ;;  %v753_v28 = vunpack.c.0.s8 %v752_v24  ;;  %v755_v29 = vshrl.u32 %v754_v25, 7 }
 0x293   :  { %v249_v33 = vpack.c.bf16 %v248_v32, %v247_v31  ;;  %v756_v30 = vsub.s32 %v753_v28, %v755_v29  ;;  %v1622_v31 = vld [vmem:[%s2090_s10 + $0x78] sm:$0xff]   ;;  %v647_v32 = vld [vmem:[%s2089_s9] sm:$0x3f]  ;;  %s1315_s9 = sshll.u32 %s1691_s5, 4  ;;  %s1316_s9 = int_to_ptr.vmem [resolvable:$true] %s1315_s9 }
 0x294   :  { %s1663_s2 = scalar_lea.vmem %s1316_s9, 32  ;;  %p1668_p1 = scmp.lt.s32.totalorder %s1316_s9, %s1316_s9 }
 0x295   :  { %1532 = vmatpush3.bf16.msra.mxu1 %v249_v33  ;;  %v1623_v33 = vld [vmem:[%s2090_s10 + $0x38] sm:$0xff]   ;;  %p1664_p0 = scmp.ne.s32.totalorder %s1316_s9, %s1663_s2  ;;  %p1669_p2 = scmp.lt.s32.totalorder %s1663_s2, %s1663_s2 }
 0x296   :  { %1537 = vmatprep.subr.bf16.mxu1 %v1687_v1 }
 0x297   :  { %p1670_p3 = por %p1669_p2, %p1668_p1 }
 0x298   :  { %1534 = vmatmul.mubr.msk.bf16.vlgmr.msra.gmra.mrb[0].mxu1 %vm72_vm1, %v1593_v2  ;;  %v1605_v2 = vld [vmem:[%s2087_s7 + $0x8] sm:$0xff]  }
 0x299   :  { %1538 = vmatpush3.bf16.msra.mxu1 %v1598_v34  ;;  %1541 = vmatprep.mubr.msk.bf16.mxu1 %vm1688_vm0, %v1687_v1  ;;  %v757_v34 = vrot.slane %v647_v32, %v756_v30  ;;  %p1671_p4 = pnand %p1670_p3, %p1664_p0 }
 0x29a   :  { %1539 = vmatprep.subr.bf16.mxu1 %v1687_v1 }
 0x29b   :  { %v765_v36 = vcombine.high %v757_v34, %v757_v34 }
 0x29d   :  { %1540 = vmatpush3.bf16.msra.mxu1 %v1599_v35  ;;  %v1621_v35 = vld [vmem:[%s2088_s8 + $0x8] sm:$0xff]  }
 0x29e   :  { %1557 = vmatprep.subr.bf16.mxu1 %v1687_v1 }
 0x36b   :  { %v298_v38 = vpop.f32.mrb[0].mxu1 }
 0x36c   :  { %v1535_v39 = vpop.f32.mrb[1].mxu1 }
 0x36d   :  { %v301_v40 = vpop.f32.mrb[2].mxu1  ;;  %v1626_v39 = vld [vmem:[%s2090_s10 + $0x140] sm:$0xff]  }
 0x36e   :  { %v305_v41 = vpack.c.bf16 %v301_v40, %v298_v38  ;;  %v1536_v42 = vpop.f32.mrb[3].mxu1  ;;  %v787_v38 = vrot.slane %v765_v36, %v756_v30  ;;  %v1931_v40 = vrot.slane %v757_v34, %v756_v30  ;;  %v1658_v34 = vld [vmem:[%s2091_s11 + $0x8] sm:$0xff]  }
 0x36f   :  { %v1630_v42 = vld [vmem:[%s2090_s10 + $0x148] sm:$0xff]  }
 0x370   :  { %1542 = vmatmul.mubr.msk.bf16.vlgmr.msra.gmra.mrb[4].mxu1 %vm322_vm5, %v305_v41  ;;  %v1627_v41 = vld [vmem:[%s2090_s10 + $0x100] sm:$0xff]  }
 0x371   :  { %1559 = vmatprep.mubr.msk.bf16.mxu1 %vm1688_vm0, %v1687_v1 }
 0x443   :  { %v360_v46 = vpop.f32.mrb[4].mxu1 }
 0x444   :  { %v361_v47 = vadd.f32 %v1335_v45, %v360_v46  ;;  %v1543_v48 = vpop.f32.mrb[5].mxu1  ;;  %v1638_v46 = vld [vmem:[%s2090_s10 + $0x158] sm:$0xff]  }
 0x445   :  { %v363_v49 = vpop.f32.mrb[6].mxu1  ;;  %v1642_v48 = vld [vmem:[%s2090_s10 + $0x160] sm:$0xff]  }
 0x446   :  { %v364_v50 = vadd.f32 %v1335_v45, %v363_v49  ;;  %v1544_v51 = vpop.f32.mrb[7].mxu1  ;;  %v367_v52 = vmax.f32 %v361_v47, 0.0  ;;  %v1635_v45 = vld [vmem:[%s2090_s10 + $0x110] sm:$0xff]   ;;  %v1639_v47 = vld [vmem:[%s2090_s10 + $0x118] sm:$0xff]   ;;  %v1643_v49 = vld [vmem:[%s2090_s10 + $0x120] sm:$0xff]  }
 0x447   :  { %v1647_v51 = vld [vmem:[%s2090_s10 + $0x128] sm:$0xff]  }
 0x448   :  { %v368_v53 = vmax.f32 %v364_v50, 0.0  ;;  %v1646_v50 = vld [vmem:[%s2090_s10 + $0x168] sm:$0xff]  }
 0x44a   :  { %v369_v54 = vpack.c.bf16 %v368_v53, %v367_v52  ;;  %v1650_v52 = vld [vmem:[%s2090_s10 + $0x170] sm:$0xff]  }
 0x44b   :  { %v1651_v53 = vld [vmem:[%s2090_s10 + $0x130] sm:$0xff]  }
 0x44c   :  { %1554 = vmatmul.mubr.msk.bf16.vlgmr.msra.gmra.mrb[12].mxu0 %vm202_vm4, %v369_v54  ;;  %v750_v54 = vcombine.high %v647_v32, %v647_v32  ;;  %v1657_v32 = vld [vmem:[%s2091_s11] sm:$0xff]  }
 0x44d   :  { %1575 = vmatprep.mubr.msk.bf16.mxu0 %vm1688_vm0, %v1687_v1  ;;  %1572 = vmatpush3.bf16.msra.mxu0 %v1618_v4 }
 0x44e   :  { %1573 = vmatprep.subr.bf16.mxu0 %v1687_v1 }
 0x451   :  { %1574 = vmatpush3.bf16.msra.mxu0 %v1621_v35 }
 0x452   :  { %1460 = vmatprep.subr.bf16.mxu0 %v1624_v37 }
 0x51f   :  { %v435_v56 = vpop.f32.mrb[12].mxu0 }
 0x520   :  { %v1555_v57 = vpop.f32.mrb[13].mxu0  ;;  %v436_v59 = vadd.f32 %v1339_v55, %v435_v56  ;;  %v1654_v56 = vld [vmem:[%s2090_s10 + $0x178] sm:$0xff]  }
 0x521   :  { %v438_v58 = vpop.f32.mrb[14].mxu0  ;;  %v1655_v57 = vld [vmem:[%s2090_s10 + $0x138] sm:$0xff]  }
 0x522   :  { %v439_v60 = vadd.f32 %v1339_v55, %v438_v58  ;;  %v1556_v61 = vpop.f32.mrb[15].mxu0  ;;  %v764_v55 = vrot.slane %v750_v54, %v756_v30 }
 0x523   :  { %v1346_v61 = vld [vmem:[%s2092_s12 + $0x4] ss:$0 sm:$0xff] }
 0x524   :  { %v442_v62 = vpack.c.bf16 %v439_v60, %v436_v59  ;;  %v766_v58 = vcombine.high %v764_v55, %v764_v55  ;;  %v780_v60 = vrot.slane %v764_v55, %v756_v30 }
 0x526   :  { %1558 = vmatpush3.bf16.msra.mxu1 %v442_v62  ;;  %v794_v59 = vrot.slane %v766_v58, %v756_v30 }
 0x527   :  { %1563 = vmatprep.subr.bf16.mxu1 %v1687_v1 }
 0x529   :  { %1560 = vmatmul.mubr.msk.bf16.vlgmr.msra.gmra.mrb[8].mxu1 %vm72_vm1, %v443_v63 }
 0x52a   :  { %1564 = vmatpush3.bf16.msra.mxu1 %v1604_v0  ;;  %1567 = vmatprep.mubr.msk.bf16.mxu1 %vm1688_vm0, %v1687_v1 }
 0x52b   :  { %1565 = vmatprep.subr.bf16.mxu1 %v1687_v1 }
 0x52e   :  { %1566 = vmatpush3.bf16.msra.mxu1 %v1605_v2 }
 0x52f   :  { %1438 = vmatprep.subr.bf16.mxu1 %v1606_v3 }
 0x5fc   :  { %v481_v6 = vpop.f32.mrb[8].mxu1 }
 0x5fd   :  { %v488_v7 = vmul.f32 %v487_v5, %v481_v6  ;;  %v1561_v8 = vpop.f32.mrb[9].mxu1  ;;  %v1625_v5 = vld [vmem:[%s2090_s10 + $0x80] sm:$0xff]   ;;  %v796_v6 = vcombine.high %v787_v38, %v787_v38 }
 0x5fe   :  { %v484_v9 = vpop.f32.mrb[10].mxu1  ;;  %v1628_v8 = vld [vmem:[%s2090_s10 + $0xc8] sm:$0xff]  }
 0x5ff   :  { %v489_v11 = vpack.c.bf16 %v488_v7, %v488_v7  ;;  %v1562_v12 = vpop.f32.mrb[11].mxu1  ;;  %v1629_v9 = vld [vmem:[%s2090_s10 + $0x88] sm:$0xff]  }
 0x600   :  { %v1636_v12 = vld [vmem:[%s2090_s10 + $0xd8] sm:$0xff]  }
 0x601   :  { %1568 = vmatmul.mubr.msk.bf16.vlgmr.msra.gmra.mrb[12].mxu1 %vm322_vm5, %v489_v11  ;;  %v1633_v11 = vld [vmem:[%s2090_s10 + $0x90] sm:$0xff]  }
 0x602   :  { %1439 = vmatpush3.bf16.msra.mxu1 %v1607_v10  ;;  %1123 = vmatprep.mubr.bf16.mxu1 %v787_v38  ;;  %v1632_v10 = vld [vmem:[%s2090_s10 + $0xd0] sm:$0xff]  }
 0x603   :  { %1440 = vmatprep.subr.bf16.mxu1 %v1608_v13  ;;  %v1637_v13 = vld [vmem:[%s2090_s10 + $0x98] sm:$0xff]  }
 0x606   :  { %1441 = vmatpush3.bf16.msra.mxu1 %v1609_v14  ;;  %v1640_v14 = vld [vmem:[%s2090_s10 + $0xe0] sm:$0xff]  }
 0x607   :  { %1442 = vmatprep.subr.bf16.mxu1 %v1610_v15  ;;  %v1641_v15 = vld [vmem:[%s2090_s10 + $0xa0] sm:$0xff]  }
 0x60a   :  { %1443 = vmatpush3.bf16.msra.mxu1 %v1611_v16  ;;  %v1644_v16 = vld [vmem:[%s2090_s10 + $0xe8] sm:$0xff]  }
 0x60b   :  { %1444 = vmatprep.subr.bf16.mxu1 %v1612_v17  ;;  %v1645_v17 = vld [vmem:[%s2090_s10 + $0xa8] sm:$0xff]  }
 0x60e   :  { %1445 = vmatpush3.bf16.msra.mxu1 %v1613_v18  ;;  %v1648_v18 = vld [vmem:[%s2090_s10 + $0xf0] sm:$0xff]  }
 0x60f   :  { %1446 = vmatprep.subr.bf16.mxu1 %v1614_v19  ;;  %v1649_v19 = vld [vmem:[%s2090_s10 + $0xb0] sm:$0xff]  }
 0x612   :  { %1447 = vmatpush3.bf16.msra.mxu1 %v1615_v20  ;;  %v1652_v20 = vld [vmem:[%s2090_s10 + $0xf8] sm:$0xff]  }
 0x613   :  { %1448 = vmatprep.subr.bf16.mxu1 %v1616_v21  ;;  %v1653_v21 = vld [vmem:[%s2090_s10 + $0xb8] sm:$0xff]  }
 0x616   :  { %1449 = vmatpush3.bf16.msra.mxu1 %v1617_v22  ;;  %v795_v22 = vcombine.high %v1931_v40, %v1931_v40 }
 0x617   :  { %1450 = vmatprep.subr.bf16.mxu1 %v1619_v26 }
 0x61a   :  { %1451 = vmatpush3.bf16.msra.mxu1 %v1620_v27 }
 0x61b   :  { %1452 = vmatprep.subr.bf16.mxu1 %v1622_v31 }
 0x61e   :  { %1453 = vmatpush3.bf16.msra.mxu1 %v1623_v33 }
 0x61f   :  { %1482 = vmatprep.subr.bf16.mxu1 %v1626_v39  ;;  %v1356_v39 = vld [vmem:[%s2092_s12 + $0x8] ss:$0 sm:$0xff] }
 0x621   :  { %1124 = vmatmul.mubr.bf16.vlgmr.msra.gmra.mrb[16].mxu1 %v1931_v40 }
 0x622   :  { %1483 = vmatpush3.bf16.msra.mxu1 %v1627_v41  ;;  %1203 = vmatprep.mubr.bf16.mxu1 %v794_v59 }
 0x623   :  { %1484 = vmatprep.subr.bf16.mxu1 %v1630_v42 }
 0x626   :  { %1485 = vmatpush3.bf16.msra.mxu1 %v1631_v43 }
 0x627   :  { %1486 = vmatprep.subr.bf16.mxu1 %v1634_v44 }
 0x62a   :  { %1487 = vmatpush3.bf16.msra.mxu1 %v1635_v45 }
 0x62b   :  { %1488 = vmatprep.subr.bf16.mxu1 %v1638_v46 }
 0x62e   :  { %1489 = vmatpush3.bf16.msra.mxu1 %v1639_v47 }
 0x62f   :  { %1490 = vmatprep.subr.bf16.mxu1 %v1642_v48 }
 0x632   :  { %1491 = vmatpush3.bf16.msra.mxu1 %v1643_v49  ;;  %v1405_v49 = vld [vmem:[%s2092_s12 + $0x9] ss:$0 sm:$0xff] }
 0x633   :  { %1492 = vmatprep.subr.bf16.mxu1 %v1646_v50  ;;  %v1350_v50 = vld [vmem:[%s2092_s12 + $0x5] ss:$0 sm:$0xff] }
 0x636   :  { %1493 = vmatpush3.bf16.msra.mxu1 %v1647_v51 }
 0x637   :  { %1494 = vmatprep.subr.bf16.mxu1 %v1650_v52 }
 0x63a   :  { %1495 = vmatpush3.bf16.msra.mxu1 %v1651_v53 }
 0x63b   :  { %1496 = vmatprep.subr.bf16.mxu1 %v1654_v56 }
 0x63e   :  { %1497 = vmatpush3.bf16.msra.mxu1 %v1655_v57 }
 0x641   :  { %1204 = vmatmul.mubr.bf16.vlgmr.msra.gmra.mrb[20].mxu1 %v780_v60 }
 0x6d4   :  { %v548_v62 = vpop.f32.mrb[12].mxu1 }
 0x6d5   :  { %v549_v63 = vadd.f32 %v1346_v61, %v548_v62  ;;  %v1569_v0 = vpop.f32.mrb[13].mxu1 }
 0x6d6   :  { %v551_v2 = vpop.f32.mrb[14].mxu1 }
 0x6d7   :  { %v554_v3 = vmax.f32 %v549_v63, 0.0  ;;  %v1570_v4 = vpop.f32.mrb[15].mxu1 }
 0x6d9   :  { %v555_v7 = vpack.c.bf16 %v554_v3, %v554_v3 }
 0x6db   :  { %1576 = vmatmul.mubr.msk.bf16.vlgmr.msra.gmra.mrb[16].mxu0 %vm322_vm5, %v555_v7 }
 0x6dc   :  { %1461 = vmatpush3.bf16.msra.mxu0 %v1625_v5  ;;  %1163 = vmatprep.mubr.bf16.mxu0 %v796_v6 }
 0x6dd   :  { %1462 = vmatprep.subr.bf16.mxu0 %v1628_v8 }
 0x6e0   :  { %1463 = vmatpush3.bf16.msra.mxu0 %v1629_v9 }
 0x6e1   :  { %1464 = vmatprep.subr.bf16.mxu0 %v1632_v10  ;;  %v1409_v10 = vld [vmem:[%s2092_s12 + $0xa] ss:$0 sm:$0xff] }
 0x6e4   :  { %1465 = vmatpush3.bf16.msra.mxu0 %v1633_v11 }
 0x6e5   :  { %1466 = vmatprep.subr.bf16.mxu0 %v1636_v12  ;;  %v1410_v12 = vld [vmem:[%s2092_s12 + $0xb] ss:$0 sm:$0xff] }
 0x6e8   :  { %1467 = vmatpush3.bf16.msra.mxu0 %v1637_v13 }
 0x6e9   :  { %1468 = vmatprep.subr.bf16.mxu0 %v1640_v14 }
 0x6ec   :  { %1469 = vmatpush3.bf16.msra.mxu0 %v1641_v15 }
 0x6ed   :  { %1470 = vmatprep.subr.bf16.mxu0 %v1644_v16 }
 0x6f0   :  { %1471 = vmatpush3.bf16.msra.mxu0 %v1645_v17 }
 0x6f1   :  { %1472 = vmatprep.subr.bf16.mxu0 %v1648_v18 }
 0x6f4   :  { %1473 = vmatpush3.bf16.msra.mxu0 %v1649_v19  ;;  %v1454_v23 = vpop.f32.mrb[16].mxu1 }
 0x6f5   :  { %1474 = vmatprep.subr.bf16.mxu0 %v1652_v20  ;;  %v1455_v24 = vpop.f32.mrb[17].mxu1  ;;  %v1354_v20 = vld [vmem:[%s2092_s12 + $0x6] ss:$0 sm:$0xff] }
 0x6f6   :  { %v1457_v25 = vpop.f32.mrb[18].mxu1  ;;  %v1456_v26 = vadd.f32 %v1455_v24, %v1454_v23 }
 0x6f7   :  { %v1458_v27 = vpop.f32.mrb[19].mxu1 }
 0x6f8   :  { %1475 = vmatpush3.bf16.msra.mxu0 %v1653_v21  ;;  %v1126_v42 = vadd.f32 %v1456_v26, %v1356_v39 }
 0x6f9   :  { %1579 = vmatprep.subr.bf16.mxu0 %v1687_v1 }
 0x6fb   :  { %1164 = vmatmul.mubr.bf16.vlgmr.msra.gmra.mrb[20].mxu0 %v795_v22  ;;  %v1355_v22 = vld [vmem:[%s2092_s12 + $0x7] ss:$0 sm:$0xff] }
 0x6fc   :  { %1583 = vmatprep.mubr.msk.bf16.mxu0 %vm1688_vm0, %v1687_v1  ;;  %1580 = vmatpush3.bf16.msra.mxu0 %v1657_v32 }
 0x6fd   :  { %1581 = vmatprep.subr.bf16.mxu0 %v1687_v1 }
 0x700   :  { %1582 = vmatpush3.bf16.msra.mxu0 %v1658_v34 }
 0x714   :  { %v1498_v28 = vpop.f32.mrb[20].mxu1 }
 0x715   :  { %v1499_v29 = vpop.f32.mrb[21].mxu1 }
 0x716   :  { %v1501_v30 = vpop.f32.mrb[22].mxu1  ;;  %v1500_v31 = vadd.f32 %v1499_v29, %v1498_v28 }
 0x717   :  { %v1502_v33 = vpop.f32.mrb[23].mxu1 }
 0x7ae   :  { %v614_v35 = vpop.f32.mrb[16].mxu0 }
 0x7af   :  { %v1577_v36 = vpop.f32.mrb[17].mxu0  ;;  %v615_v55 = vadd.f32 %v1350_v50, %v614_v35 }
 0x7b0   :  { %v617_v37 = vpop.f32.mrb[18].mxu0 }
 0x7b1   :  { %v1578_v38 = vpop.f32.mrb[19].mxu0  ;;  %v623_v58 = vsel %vm622_vm6, %v615_v55, 0.0 }
 0x7ce   :  { %v1476_v40 = vpop.f32.mrb[20].mxu0 }
 0x7cf   :  { %v1477_v41 = vpop.f32.mrb[21].mxu0 }
 0x7d0   :  { %v1478_v43 = vadd.f32 %v1477_v41, %v1476_v40  ;;  %v1479_v44 = vpop.f32.mrb[22].mxu0 }
 0x7d1   :  { %v1480_v45 = vpop.f32.mrb[23].mxu0 }
 0x7d2   :  { %v1166_v1 = vadd.f32 %v1478_v43, %v1126_v42 }
 0x7d4   :  { %v1206_v46 = vadd.f32 %v1500_v31, %v1166_v1 }
 0x7d6   :  { %v1211_v47 = vmax.f32 %v1206_v46, 0.0 }
 0x7d8   :  { %v1212_v48 = vpack.c.bf16 %v1211_v47, %v1211_v47 }
 0x7da   :  { %1584 = vmatmul.mubr.msk.bf16.vlgmr.msra.gmra.mrb[24].mxu0 %vm322_vm5, %v1212_v48 }
 0x8ad   :  { %v1271_v51 = vpop.f32.mrb[24].mxu0 }
 0x8ae   :  { %v1272_v52 = vadd.f32 %v1405_v49, %v1271_v51  ;;  %v1585_v53 = vpop.f32.mrb[25].mxu0 }
 0x8af   :  { %v1274_v54 = vpop.f32.mrb[26].mxu0 }
 0x8b0   :  { %v1586_v56 = vpop.f32.mrb[27].mxu0  ;;  %v1279_v57 = vsel %vm622_vm6, %v1272_v52, 0.0 }
 0x8b1   :  { %1280 = vadd.xlane.f32.xlu0 %v1279_v57 }
 0x8b5   :  { %624 = vadd.xlane.f32.xlu0 %v623_v58 }
 0x93e   :  { %v1281_v59 = vpop.xlane.xlu0 %1280 }
 0x93f   :  { %v1282_v60 = vmul.f32 0.0625, %v1281_v59 }
 0x941   :  { %v1283_v61 = vsub.f32 %v1272_v52, %v1282_v60 }
 0x942   :  { %v625_v62 = vpop.xlane.xlu0 %624 }
 0x943   :  { %v627_v63 = vmul.f32 0.0625, %v625_v62  ;;  %v1284_v0 = vmul.f32 %v1283_v61, %v1283_v61 }
 0x945   :  { %v628_v2 = vsub.f32 %v615_v55, %v627_v63  ;;  %v1285_v3 = vsel %vm622_vm6, %v1284_v0, 0.0 }
 0x946   :  { %1286 = vadd.xlane.f32.xlu1 %v1285_v3 }
 0x947   :  { %v629_v4 = vmul.f32 %v628_v2, %v628_v2 }
 0x949   :  { %v630_v5 = vsel %vm622_vm6, %v629_v4, 0.0 }
 0x94a   :  { %631 = vadd.xlane.f32.xlu1 %v630_v5 }
 0x9d3   :  { %v1287_v6 = vpop.xlane.xlu1 %1286 }
 0x9d4   :  { %v1288_v7 = vmul.f32 0.0625, %v1287_v6 }
 0x9d6   :  { %v1289_v8 = vadd.f32 1e-05, %v1288_v7 }
 0x9d7   :  { %v632_v15 = vpop.xlane.xlu1 %631 }
 0x9d8   :  { %1659 = vrsqrt.f32 %v1289_v8  ;;  %v633_v16 = vmul.f32 0.0625, %v632_v15 }
 0x9da   :  { %v634_v17 = vadd.f32 1e-05, %v633_v16 }
 0x9dc   :  { %1661 = vrsqrt.f32 %v634_v17 }
 0x9e2   :  { %v1660_v9 = vpop.eup %1659 }
 0x9e3   :  { %v1291_v11 = vmul.f32 %v1660_v9, %v1283_v61 }
 0x9e5   :  { %v1296_v13 = vmul.f32 %v1409_v10, %v1291_v11 }
 0x9e6   :  { %v1662_v18 = vpop.eup %1661 }
 0x9e7   :  { %v1301_v14 = vadd.f32 %v1410_v12, %v1296_v13  ;;  %v636_v19 = vmul.f32 %v1662_v18, %v628_v2 }
 0x9e9   :  { %1303 = vrot.lane.b32.xlu0 %v1301_v14, %s1690_s1  ;;  %v641_v21 = vmul.f32 %v1354_v20, %v636_v19 }
 0x9eb   :  { %v646_v23 = vadd.f32 %v1355_v22, %v641_v21 }
 0xa5b   :  { %v1304_v24 = vpop.permute.xlu0 %1303 }
 0xa5c   :  { %v1306_v25 = vsel %vm72_vm1, %v646_v23, %v1304_v24 }
 0xa5d   :  { %v1307_v26 = vsel %vm322_vm5, %v1306_v25, 0.0 }
 0xa5e   :  { %1308 = vst [vmem:[#allocation2] sm:$0x3] %v1307_v26 }
 0xa5f   :  { %1674 = shalt.err (!%p1671_p4)
}
 0xa60   :  { %s1675_s12 = scalar_lea.hbm %s2093_s13, 32 }
 0xa61   :  { %p1676_p5 = scmp.ne.s32.totalorder %s2093_s13, %s1675_s12  ;;  %p1679_p6 = scmp.lt.u32.totalorder %s1675_s12, %s2093_s13 }
 0xa63   :  { %p1681_p7 = pnand %p1679_p6, %p1676_p5 }
 0xa65   :  { %1684 = shalt.err (!%p1681_p7)
}
 0xa66   :  { %1318 = dma.vmem_to_hbm [thread:$0]  %s1316_s9, 32, %s2093_s13, [#allocation3]  }
 0xa67   :  { %1685 = dma.done.wait [#allocation3], 32  }
 0xa68   :  { %1686 = vsyncadd [#allocation3], 4294967264 }
 0xa69   :  { %1322 = vsyncpa [#allocation3], 1 }

</bundles_post_ra>
